<compile_context>
chip_gen: v7x
topology: tpu7x:2x2x1
jax: 0.10.0
libtpu: 0.0.40
codegen_flags: <defaults>
</compile_context>

<pallas_src>
import functools

import jax
import jax.numpy as jnp
from jax import lax
from jax.experimental import pallas as pl
from jax.experimental.pallas import tpu as pltpu


def _round_up(x: int, m: int) -> int:
    return (x + m - 1) // m * m


def _vmem_capacity_bytes() -> int:
    try:
        return int(pltpu.get_tpu_info().vmem_capacity_bytes)
    except Exception:
        return 64 * 1024 * 1024          # conservative fallback (v7x per-TC)


def _prenorm_linear_kernel(x_ref, gamma_ref, beta_ref, w_ref, b_ref, o_ref,
                           normed_ref, *, eps: float, norm_type: str,
                           norm_chunk: int):
    # x_ref: (tm, D) row tile; gamma/beta: (1, D); w_ref: (D, tn);
    # b_ref: (1, tn); o_ref: (tm, tn); normed_ref: (tm, D) VMEM scratch.
    #
    # Normalization depends only on the row tile (grid axis 0): it is computed
    # once when entering a new row tile (j == 0), in row sub-chunks to bound
    # vreg pressure, and cached in VMEM scratch in the MXU operand dtype.
    @pl.when(pl.program_id(1) == 0)
    def _():
        gamma_f = gamma_ref[...].astype(jnp.float32)
        if norm_type == "layernorm":
            beta_f = beta_ref[...].astype(jnp.float32)

        def _norm_one_chunk(c, carry):
            r0 = pl.multiple_of(c * norm_chunk, norm_chunk)
            xf = x_ref[pl.ds(r0, norm_chunk), :].astype(jnp.float32)
            if norm_type == "layernorm":
                mean = jnp.mean(xf, axis=-1, keepdims=True)
                xc = xf - mean
                var = jnp.mean(xc * xc, axis=-1, keepdims=True)
                normed = xc * lax.rsqrt(var + eps) * gamma_f + beta_f
            elif norm_type == "rmsnorm":
                ms = jnp.mean(xf * xf, axis=-1, keepdims=True)
                # torch ref: x.float() -> normalize -> type_as(x) -> * weight
                normed = (xf * lax.rsqrt(ms + eps)).astype(x_ref.dtype) \
                             .astype(jnp.float32) * gamma_f
            else:
                raise ValueError(f"Unknown norm_type: {norm_type}")
            normed_ref[pl.ds(r0, norm_chunk), :] = normed.astype(
                normed_ref.dtype)
            return carry

        n_chunks = normed_ref.shape[0] // norm_chunk
        lax.fori_loop(0, n_chunks, _norm_one_chunk, None, unroll=True)

    # fn = Linear(dim, hidden): normed @ W + b  (MXU matmul, f32 accumulate)
    y = jnp.dot(normed_ref[...], w_ref[...],
                preferred_element_type=jnp.float32)
    y = y + b_ref[...].astype(jnp.float32)
    o_ref[...] = y.astype(o_ref.dtype)


def prenorm_linear(x, gamma, beta, w, b, *, eps=None, norm_type="layernorm",
                   tm=1024, tn=512, matmul_dtype=None):
    """x: (B, S, D) -> (B, S, H).  Fused (layer|rms)norm + linear."""
    if eps is None:
        eps = 1e-5 if norm_type == "layernorm" else 1e-6

    B, S, D = x.shape
    H = w.shape[1]
    M = B * S

    # MXU-operand dtype: native bf16 path if either operand is already bf16;
    # otherwise keep fp32 (slower emulated MXU path but bit-faithful to the
    # torch fp32 reference).  Pass matmul_dtype=jnp.bfloat16 explicitly to
    # trade precision for ~2-3x MXU throughput on fp32 models.
    if matmul_dtype is None:
        matmul_dtype = (jnp.bfloat16
                        if (x.dtype == jnp.bfloat16 or w.dtype == jnp.bfloat16)
                        else jnp.float32)
    matmul_dtype = jnp.dtype(matmul_dtype)
    if w.dtype != matmul_dtype:
        w = w.astype(matmul_dtype)

    x_it = jnp.dtype(x.dtype).itemsize
    w_it = matmul_dtype.itemsize
    o_it = jnp.dtype(x.dtype).itemsize

    # --- tile selection ------------------------------------------------------
    row_align = 16 if x.dtype == jnp.bfloat16 else 8
    tm = max(row_align, min(tm, _round_up(M, row_align)))
    tm = _round_up(tm, row_align)
    H_out = _round_up(H, 128)            # lane-dense output stores (no vst.msk)
    tn = min(_round_up(max(tn, 128), 128), H_out)

    def _est(tm_, tn_):                  # double-buffered in/out + scratch
        in_b = 2 * (tm_ * D * x_it + D * tn_ * w_it
                    + tn_ * jnp.dtype(b.dtype).itemsize
                    + 2 * D * jnp.dtype(gamma.dtype).itemsize)
        out_b = 2 * tm_ * tn_ * o_it
        scratch_b = tm_ * D * w_it
        return in_b + out_b + scratch_b

    vmem_cap = _vmem_capacity_bytes()
    budget = int(0.75 * vmem_cap)        # generation-aware (128 MiB v5e/v6e,
    while _est(tm, tn) > budget and tm > row_align:      # 64 MiB per-TC v7x)
        tm = max(row_align, _round_up(tm // 2, row_align))
    while _est(tm, tn) > budget and tn > 128:
        tn = max(128, _round_up(tn // 2, 128))

    # Norm sub-chunk (<= 256 rows) that divides tm: bounds fp32 temporaries.
    norm_chunk = tm
    for c in (256, 128, 64, 32, 16, 8):
        if tm % c == 0:
            norm_chunk = c
            break

    x2 = x.reshape(M, D)                 # metadata-only reshape
    gamma2 = gamma.reshape(1, D)
    beta2 = beta.reshape(1, D)
    b2 = b.reshape(1, H)

    # Ragged last row tile / hidden tile handled by Pallas masked loads+stores
    # (no wrapper jnp.pad, no extra HBM passes over x / W / out).
    grid = (pl.cdiv(M, tm), pl.cdiv(H_out, tn))

    kernel = functools.partial(_prenorm_linear_kernel, eps=eps,
                               norm_type=norm_type, norm_chunk=norm_chunk)

    vmem_limit = int(min(int(0.85 * vmem_cap),
                         max(32 * 1024 * 1024,
                             _est(tm, tn) + 4 * 1024 * 1024)))

    out = pl.pallas_call(
        kernel,
        out_shape=jax.ShapeDtypeStruct((M, H_out), x.dtype),
        grid_spec=pltpu.PrefetchScalarGridSpec(
            num_scalar_prefetch=0,
            grid=grid,
            in_specs=[
                pl.BlockSpec((tm, D), lambda i, j: (i, 0)),   # x row tile
                pl.BlockSpec((1, D), lambda i, j: (0, 0)),    # norm weight
                pl.BlockSpec((1, D), lambda i, j: (0, 0)),    # norm bias
                pl.BlockSpec((D, tn), lambda i, j: (0, j)),   # linear weight
                pl.BlockSpec((1, tn), lambda i, j: (0, j)),   # linear bias
            ],
            out_specs=pl.BlockSpec((tm, tn), lambda i, j: (i, j)),
            scratch_shapes=[pltpu.VMEM((tm, D), matmul_dtype)],  # cached norm
        ),
        compiler_params=pltpu.CompilerParams(
            # Row axis is megacore-parallel; the hidden axis carries the
            # cached normed-row scratch, so it stays "arbitrary" (innermost).
            dimension_semantics=("parallel", "arbitrary"),
            vmem_limit_bytes=vmem_limit,
        ),
    )(x2, gamma2, beta2, w, b2)

    if H_out > H:                        # only when H is not lane-aligned
        out = out[:, :H]
    return out.reshape(B, S, H)


def _reference(x, gamma, beta, w, b, *, eps=None, norm_type="layernorm"):
    if eps is None:
        eps = 1e-5 if norm_type == "layernorm" else 1e-6
    xf = x.astype(jnp.float32)
    if norm_type == "layernorm":
        mean = jnp.mean(xf, axis=-1, keepdims=True)
        var = jnp.mean((xf - mean) ** 2, axis=-1, keepdims=True)
        normed = (xf - mean) * lax.rsqrt(var + eps) * gamma + beta
    else:
        ms = jnp.mean(xf * xf, axis=-1, keepdims=True)
        normed = (xf * lax.rsqrt(ms + eps)).astype(x.dtype).astype(
            jnp.float32) * gamma
    normed = normed.astype(x.dtype)      # torch: norm output dtype == input
    y = jnp.dot(normed, w, preferred_element_type=jnp.float32) + b
    return y.astype(x.dtype)


if __name__ == "__main__":
    key = jax.random.PRNGKey(0)

    def run_case(case_id, B, S, D, H, norm_type, dtype=jnp.float32,
                 tm=1024, tn=512, atol=1e-4, rtol=1e-4):
        k = jax.random.fold_in(key, case_id)
        kx, kw, kb, kg, kbe = jax.random.split(k, 5)
        x = jax.random.normal(kx, (B, S, D), dtype=jnp.float32).astype(dtype)
        # norm params (perturbed away from the torch init to exercise them)
        gamma = 1.0 + 0.1 * jax.random.normal(kg, (D,), dtype=jnp.float32)
        beta = 0.05 * jax.random.normal(kbe, (D,), dtype=jnp.float32)
        # fn = Linear(D, H)
        w = (jax.random.normal(kw, (D, H), dtype=jnp.float32)
             * (1.0 / D ** 0.5)).astype(dtype)
        b = jax.random.normal(kb, (H,), dtype=jnp.float32) * 0.01

        y = prenorm_linear(x, gamma, beta, w, b, norm_type=norm_type,
                           tm=tm, tn=tn)
        jax.block_until_ready(y)
        ref = _reference(x, gamma, beta, w, b, norm_type=norm_type)
        assert y.shape == (B, S, H)
        assert jnp.allclose(y.astype(jnp.float32), ref.astype(jnp.float32),
                            atol=atol, rtol=rtol), (
            f"mismatch: norm={norm_type} dtype={dtype} "
            f"shape=({B},{S},{D})->{H}")

    # canonical small shapes (PreNorm default = layernorm, and rmsnorm), fp32
    run_case(0, 2, 8, 32, 64, "layernorm")
    run_case(1, 2, 8, 32, 64, "rmsnorm")
    # ragged row count (masked last row tile, no wrapper padding) and a
    # multi-tile hidden axis (exercises the pl.when(j == 0) cached-norm path)
    run_case(2, 3, 5, 32, 256, "layernorm", tn=128)
    run_case(3, 3, 5, 32, 256, "rmsnorm", tn=128)
    # bf16 fast path: native MXU operands, f32 accumulate (looser tolerance)
    run_case(4, 2, 64, 128, 256, "layernorm", dtype=jnp.bfloat16,
             atol=1e-1, rtol=1e-1)

    # TODO(synk): PreNorm.fn is an arbitrary wrapped module; only the
    # canonical fn = nn.Linear(dim, hidden) epilogue is fused here.
    print("KERNEL_OK")
</pallas_src>

<mosaic_0001>
module attributes {stable_mosaic.version = 11 : i64} {
  func.func @_prenorm_linear_kernel(%arg0: i32, %arg1: i32, %arg2: memref<16x32xf32, #tpu.memory_space<vmem>>, %arg3: memref<1x32xf32, #tpu.memory_space<vmem>>, %arg4: memref<1x32xf32, #tpu.memory_space<vmem>>, %arg5: memref<32x128xf32, #tpu.memory_space<vmem>>, %arg6: memref<1x128xf32, #tpu.memory_space<vmem>>, %arg7: memref<16x128xf32, #tpu.memory_space<vmem>>, %arg8: memref<16x32xf32, #tpu.memory_space<vmem>>) attributes {dimension_semantics = [#tpu.dimension_semantics<parallel>, #tpu.dimension_semantics<arbitrary>], iteration_bounds = array<i64: 1, 1>, scalar_prefetch = 0 : i64, scratch_operands = 1 : i64, tpu.core_type = #tpu.core_type<tc>, window_params = [{transform_indices = @transform_0, window_bounds = array<i64: 16, 32>}, {pipeline_mode = #tpu.pipeline_mode<synchronous>, transform_indices = @transform_1, window_bounds = array<i64: 1, 32>}, {pipeline_mode = #tpu.pipeline_mode<synchronous>, transform_indices = @transform_2, window_bounds = array<i64: 1, 32>}, {transform_indices = @transform_3, window_bounds = array<i64: 32, 128>}, {transform_indices = @transform_4, window_bounds = array<i64: 1, 128>}, {transform_indices = @transform_5, window_bounds = array<i64: 16, 128>}]} {
    %c0_i32 = arith.constant 0 : i32
    %0 = arith.cmpi eq, %arg1, %c0_i32 : i32
    %1 = arith.extui %0 : i1 to i32
    %c0_i32_0 = arith.constant 0 : i32
    %2 = arith.cmpi ne, %1, %c0_i32_0 : i32
    scf.if %2 {
      %c0_8 = arith.constant 0 : index
      %c0_9 = arith.constant 0 : index
      %10 = vector.load %arg3[%c0_8, %c0_9] : memref<1x32xf32, #tpu.memory_space<vmem>>, vector<1x32xf32>
      %c0_10 = arith.constant 0 : index
      %c0_11 = arith.constant 0 : index
      %11 = vector.load %arg4[%c0_10, %c0_11] : memref<1x32xf32, #tpu.memory_space<vmem>>, vector<1x32xf32>
      %c0_i32_12 = arith.constant 0 : i32
      %c16_i32 = arith.constant 16 : i32
      %12 = arith.muli %c0_i32_12, %c16_i32 : i32
      %13 = tpu.assume_multiple %12, 16 : i32
      %14 = arith.index_cast %13 : i32 to index
      %c0_13 = arith.constant 0 : index
      %15 = vector.load %arg2[%14, %c0_13] : memref<16x32xf32, #tpu.memory_space<vmem>>, vector<16x32xf32>
      %cst_14 = arith.constant dense<0.000000e+00> : vector<16xf32>
      %16 = vector.multi_reduction <add>, %15, %cst_14 [1] : vector<16x32xf32> to vector<16xf32>
      %17 = vector.shape_cast %16 : vector<16xf32> to vector<16x1xf32>
      %cst_15 = arith.constant 3.200000e+01 : f32
      %18 = vector.broadcast %cst_15 : f32 to vector<16x1xf32>
      %19 = arith.divf %17, %18 : vector<16x1xf32>
      %20 = vector.broadcast %19 : vector<16x1xf32> to vector<16x32xf32>
      %21 = arith.subf %15, %20 : vector<16x32xf32>
      %22 = arith.mulf %21, %21 : vector<16x32xf32>
      %cst_16 = arith.constant dense<0.000000e+00> : vector<16xf32>
      %23 = vector.multi_reduction <add>, %22, %cst_16 [1] : vector<16x32xf32> to vector<16xf32>
      %24 = vector.shape_cast %23 : vector<16xf32> to vector<16x1xf32>
      %cst_17 = arith.constant 3.200000e+01 : f32
      %25 = vector.broadcast %cst_17 : f32 to vector<16x1xf32>
      %26 = arith.divf %24, %25 : vector<16x1xf32>
      %cst_18 = arith.constant 9.99999974E-6 : f32
      %27 = vector.broadcast %cst_18 : f32 to vector<16x1xf32>
      %28 = arith.addf %26, %27 : vector<16x1xf32>
      %29 = math.rsqrt %28 : vector<16x1xf32>
      %30 = vector.broadcast %29 : vector<16x1xf32> to vector<16x32xf32>
      %31 = arith.mulf %21, %30 : vector<16x32xf32>
      %32 = vector.broadcast %10 : vector<1x32xf32> to vector<16x32xf32>
      %33 = arith.mulf %31, %32 : vector<16x32xf32>
      %34 = vector.broadcast %11 : vector<1x32xf32> to vector<16x32xf32>
      %35 = arith.addf %33, %34 : vector<16x32xf32>
      %36 = arith.index_cast %13 : i32 to index
      %c0_19 = arith.constant 0 : index
      %37 = vector.load %arg8[%36, %c0_19] : memref<16x32xf32, #tpu.memory_space<vmem>>, vector<16x32xf32>
      tpu.vector_store %arg8[%36, %c0_19], %35 {strides = array<i32>} : memref<16x32xf32, #tpu.memory_space<vmem>>, vector<16x32xf32>,
      %c1_i32 = arith.constant 1 : i32
    } else {
    }
    %c0 = arith.constant 0 : index
    %c0_1 = arith.constant 0 : index
    %3 = vector.load %arg8[%c0, %c0_1] : memref<16x32xf32, #tpu.memory_space<vmem>>, vector<16x32xf32>
    %c0_2 = arith.constant 0 : index
    %c0_3 = arith.constant 0 : index
    %4 = vector.load %arg5[%c0_2, %c0_3] : memref<32x128xf32, #tpu.memory_space<vmem>>, vector<32x128xf32>
    %cst = arith.constant dense<0.000000e+00> : vector<16x128xf32>
    %5 = tpu.matmul %3, %4, %cst {dimension_numbers = #tpu.dot_dimension_numbers<[1], [0], [0], [1], [0, 0, 1, 1], [], []>} : vector<16x32xf32>, vector<32x128xf32>, vector<16x128xf32> -> vector<16x128xf32>
    %c0_4 = arith.constant 0 : index
    %c0_5 = arith.constant 0 : index
    %6 = vector.load %arg6[%c0_4, %c0_5] : memref<1x128xf32, #tpu.memory_space<vmem>>, vector<1x128xf32>
    %7 = vector.broadcast %6 : vector<1x128xf32> to vector<16x128xf32>
    %8 = arith.addf %5, %7 : vector<16x128xf32>
    %c0_6 = arith.constant 0 : index
    %c0_7 = arith.constant 0 : index
    %9 = vector.load %arg7[%c0_6, %c0_7] : memref<16x128xf32, #tpu.memory_space<vmem>>, vector<16x128xf32>
    tpu.vector_store %arg7[%c0_6, %c0_7], %8 {strides = array<i32>} : memref<16x128xf32, #tpu.memory_space<vmem>>, vector<16x128xf32>,
    return
  }
  func.func @transform_0(%arg0: i32, %arg1: i32) -> (i32, i32) {
    %c0_i32 = arith.constant 0 : i32
    %c0_i32_0 = arith.constant 0 : i32
    return %arg0, %c0_i32 : i32, i32
  }
  func.func @transform_1(%arg0: i32, %arg1: i32) -> (i32, i32) {
    %c0_i32 = arith.constant 0 : i32
    %c0_i32_0 = arith.constant 0 : i32
    %c0_i32_1 = arith.constant 0 : i32
    return %c0_i32, %c0_i32_0 : i32, i32
  }
  func.func @transform_2(%arg0: i32, %arg1: i32) -> (i32, i32) {
    %c0_i32 = arith.constant 0 : i32
    %c0_i32_0 = arith.constant 0 : i32
    %c0_i32_1 = arith.constant 0 : i32
    return %c0_i32, %c0_i32_0 : i32, i32
  }
  func.func @transform_3(%arg0: i32, %arg1: i32) -> (i32, i32) {
    %c0_i32 = arith.constant 0 : i32
    %c0_i32_0 = arith.constant 0 : i32
    return %c0_i32, %arg1 : i32, i32
  }
  func.func @transform_4(%arg0: i32, %arg1: i32) -> (i32, i32) {
    %c0_i32 = arith.constant 0 : i32
    %c0_i32_0 = arith.constant 0 : i32
    return %c0_i32, %arg1 : i32, i32
  }
  func.func @transform_5(%arg0: i32, %arg1: i32) -> (i32, i32) {
    %c0_i32 = arith.constant 0 : i32
    return %arg0, %arg1 : i32, i32
  }
}

</mosaic_0001>

<bundles_post_ra>
// kernel: tpu_custom_call.1
= control target key start
LH: loop header
LB: loop body
LE: loop exit
PB: predicated region body
PF: predicated region fallthrough
CT: control target
= control target key end

     0   :  { %10 = vsyncpa [#allocation4], 0  ;;  %s426_s0 = inlined_call_operand.hbm [shape: f32[16,32], index: 0, kind: input, shape index: {}]   ;;  %s427_s1 = inlined_call_operand.vmem [shape: f32[1,32], index: 1, kind: input, shape index: {}]   ;;  %s428_s2 = inlined_call_operand.vmem [shape: f32[1,32], index: 2, kind: input, shape index: {}]   ;;  %s429_s3 = inlined_call_operand.hbm [shape: f32[32,64], index: 3, kind: input, shape index: {}]   ;;  %s430_s4 = inlined_call_operand.vmem [shape: f32[1,64], index: 4, kind: input, shape index: {}]   ;;  %s431_s5 = inlined_call_operand.hbm [shape: f32[16,128], index: 5, kind: output, shape index: {}]  }
   0x1   :  { %11 = vsyncpa [#allocation7], 0 }
   0x2   :  { %12 = vsyncpa [#allocation5], 0  ;;  %s329_s18 = smov [#allocation3]   ;;  %s257_s22 = scalar_lea.hbm %s426_s0, 256 }
   0x3   :  { %s18_s19 = sshll.u32 %s329_s18, 4  ;;  %p258_p0 = scmp.ne.s32.totalorder %s426_s0, %s257_s22  ;;  %s19_s19 = int_to_ptr.vmem [resolvable:$true] %s18_s19 }
   0x4   :  { %p261_p1 = scmp.lt.u32.totalorder %s257_s22, %s426_s0 }
   0x6   :  { %p263_p2 = pnand %p261_p1, %p258_p0 }
   0x8   :  { %266 = shalt.err (!%p263_p2)
}
   0x9   :  { %s267_s27 = scalar_lea.vmem %s19_s19, 256  ;;  %p272_p4 = scmp.lt.s32.totalorder %s19_s19, %s19_s19 }
   0xa   :  { %p268_p3 = scmp.ne.s32.totalorder %s19_s19, %s267_s27  ;;  %p273_p5 = scmp.lt.s32.totalorder %s267_s27, %s267_s27 }
   0xc   :  { %p274_p6 = por %p273_p5, %p272_p4 }
   0xe   :  { %p275_p7 = pnand %p274_p6, %p268_p3 }
  0x10   :  { %278 = shalt.err (!%p275_p7)
}
  0x11   :  { %s330_s28 = smov 128   ;;  %s331_s29 = smov 8  }
  0x12   :  { %24 = dma.hbm_to_vmem [thread:$0]  %s426_s0, 256, %s19_s19, [#allocation4], %s330_s28, %s330_s28, %s331_s29  }
  0x13   :  { %s332_s7 = smov [#allocation6]   ;;  %s279_s11 = scalar_lea.hbm %s429_s3, 512 }
  0x14   :  { %s34_s8 = sshll.u32 %s332_s7, 4  ;;  %p280_p8 = scmp.ne.s32.totalorder %s429_s3, %s279_s11  ;;  %s35_s8 = int_to_ptr.vmem [resolvable:$true] %s34_s8 }
  0x15   :  { %p283_p9 = scmp.lt.u32.totalorder %s279_s11, %s429_s3 }
  0x17   :  { %p285_p10 = pnand %p283_p9, %p280_p8 }
  0x19   :  { %288 = shalt.err (!%p285_p10)
}
  0x1a   :  { %s289_s16 = scalar_lea.vmem %s35_s8, 512  ;;  %p294_p12 = scmp.lt.s32.totalorder %s35_s8, %s35_s8 }
  0x1b   :  { %p290_p11 = scmp.ne.s32.totalorder %s35_s8, %s289_s16  ;;  %p295_p13 = scmp.lt.s32.totalorder %s289_s16, %s289_s16 }
  0x1d   :  { %p296_p0 = por %p295_p13, %p294_p12 }
  0x1f   :  { %p297_p1 = pnand %p296_p0, %p290_p11 }
  0x21   :  { %300 = shalt.err (!%p297_p1)
}
  0x22   :  { %40 = dma.hbm_to_vmem [thread:$0]  %s429_s3, 512, %s35_s8, [#allocation7], %s330_s28, %s330_s28, %s331_s29  }
  0x23   :  { %323 = dma.done.wait [#allocation4], 256  }
  0x24   :  { %324 = vsyncadd [#allocation4], 4294967040 }
  0x25   :  { %325 = dma.done.wait [#allocation7], 512  }
  0x26   :  { %326 = vsyncadd [#allocation7], 4294966784  ;;  %vm57_vm0 = vcmask 261120   ;;  %v55_v0 = vld [vmem:[#allocation3] sm:$0xff]  ;;  %v56_v1 = vld [vmem:[#allocation3 + $0x8] sm:$0xff] }
  0x27   :  { %v58_v2 = vsel %vm57_vm0, %v55_v0, 0.0  ;;  %v61_v3 = vsel %vm57_vm0, %v56_v1, 0.0  ;;  %v105_v14 = vld [vmem:[#allocation6] sm:$0xff]  ;;  %v106_v15 = vld [vmem:[#allocation6 + $0x8] sm:$0xff]  ;;  %v107_v17 = vld [vmem:[#allocation6 + $0x10] sm:$0xff] }
  0x28   :  { %59 = vadd.xlane.f32.xlu0 %v58_v2  ;;  %v240_v16 = vpack.c.bf16 %v106_v15, %v105_v14  ;;  %v108_v18 = vld [vmem:[#allocation6 + $0x18] sm:$0xff]  ;;  %v218_v27 = vld [vmem:[%s427_s1] ss:$0 sm:$0xff] }
  0x29   :  { %v244_v19 = vpack.c.bf16 %v108_v18, %v107_v17  ;;  %v219_v29 = vld [vmem:[%s428_s2] ss:$0 sm:$0xff]  ;;  %s333_s2 = smov [#allocation8]  }
  0x2a   :  { %241 = vmatprep.subr.bf16.mxu0 %v240_v16  ;;  %v220_v38 = vld [vmem:[%s430_s4] ss:$0 sm:$0xff]  ;;  %s205_s22 = sshll.u32 %s333_s2, 4  ;;  %s206_s22 = int_to_ptr.vmem [resolvable:$true] %s205_s22 }
  0x2b   :  { %243 = vmatpush3.bf16.msra.mxu0 %v240_v16  ;;  %s301_s23 = scalar_lea.vmem %s206_s22, 256  ;;  %p306_p3 = scmp.lt.s32.totalorder %s206_s22, %s206_s22 }
  0x2c   :  { %62 = vadd.xlane.f32.xlu0 %v61_v3  ;;  %245 = vmatprep.subr.bf16.mxu0 %v244_v19  ;;  %p302_p2 = scmp.ne.s32.totalorder %s206_s22, %s301_s23  ;;  %p307_p4 = scmp.lt.s32.totalorder %s301_s23, %s301_s23 }
  0x2e   :  { %p308_p5 = por %p307_p4, %p306_p3 }
  0x2f   :  { %247 = vmatpush3.bf16.msra.mxu0 %v244_v19 }
  0x30   :  { %p309_p6 = pnand %p308_p5, %p302_p2 }
  0xb5   :  { %v60_v4 = vpop.xlane.xlu0 %59 }
  0xb6   :  { %v65_v5 = vmul.f32 0.03125, %v60_v4 }
  0xb8   :  { %v67_v6 = vsub.f32 %v55_v0, %v65_v5 }
  0xb9   :  { %v63_v7 = vpop.xlane.xlu0 %62 }
  0xba   :  { %v66_v8 = vmul.f32 0.03125, %v63_v7  ;;  %v69_v9 = vmul.f32 %v67_v6, %v67_v6 }
  0xbc   :  { %v68_v10 = vsub.f32 %v56_v1, %v66_v8  ;;  %v71_v11 = vsel %vm57_vm0, %v69_v9, 0.0 }
  0xbd   :  { %72 = vadd.xlane.f32.xlu1 %v71_v11 }
  0xbe   :  { %v70_v12 = vmul.f32 %v68_v10, %v68_v10 }
  0xc0   :  { %v74_v13 = vsel %vm57_vm0, %v70_v12, 0.0 }
  0xc1   :  { %75 = vadd.xlane.f32.xlu1 %v74_v13 }
 0x14a   :  { %v73_v20 = vpop.xlane.xlu1 %72 }
 0x14b   :  { %v77_v21 = vmul.f32 0.03125, %v73_v20 }
 0x14d   :  { %v79_v22 = vadd.f32 1e-05, %v77_v21 }
 0x14e   :  { %v76_v23 = vpop.xlane.xlu1 %75 }
 0x14f   :  { %253 = vrsqrt.f32 %v79_v22  ;;  %v78_v24 = vmul.f32 0.03125, %v76_v23 }
 0x151   :  { %v80_v25 = vadd.f32 1e-05, %v78_v24 }
 0x153   :  { %255 = vrsqrt.f32 %v80_v25 }
 0x159   :  { %v254_v26 = vpop.eup %253 }
 0x15a   :  { %v83_v28 = vmul.f32 %v254_v26, %v67_v6 }
 0x15c   :  { %v91_v30 = vmul.f32 %v218_v27, %v83_v28 }
 0x15d   :  { %v256_v31 = vpop.eup %255 }
 0x15e   :  { %v99_v32 = vadd.f32 %v219_v29, %v91_v30  ;;  %v84_v33 = vmul.f32 %v256_v31, %v68_v10 }
 0x160   :  { %101 = vst.msk [vmem:[#allocation2] sm:$0xff] %vm57_vm0, %v99_v32  ;;  %v92_v34 = vmul.f32 %v218_v27, %v84_v33 }
 0x162   :  { %v100_v35 = vadd.f32 %v219_v29, %v92_v34 }
 0x164   :  { %102 = vst.msk [vmem:[#allocation2 + $0x8] sm:$0xff] %vm57_vm0, %v100_v35 }
 0x167   :  { %v103_v36 = vld [vmem:[#allocation2] sm:$0xff] }
 0x168   :  { %237 = vmatprep.mubr.msk.f32.mxu0 %vm57_vm0, %v103_v36 }
 0x16b   :  { %v104_v37 = vld [vmem:[#allocation2 + $0x8] sm:$0xff] }
 0x16c   :  { %238 = vmatmul.mubr.msk.f32.vlgmr.msra.gmra.mrb[0].mxu0 %vm57_vm0, %v104_v37 }
 0x23f   :  { %v239_v39 = vpop.f32.mrb[0].mxu0 }
 0x240   :  { %v195_v40 = vadd.f32 %v239_v39, %v220_v38  ;;  %v189_v41 = vpop.f32.mrb[1].mxu0 }
 0x241   :  { %v190_v42 = vadd.f32 %v220_v38, %v189_v41 }
 0x242   :  { %199 = vst [vmem:[#allocation8 + $0x8] sm:$0xff] %v195_v40 }
 0x243   :  { %198 = vst [vmem:[#allocation8] sm:$0xff] %v190_v42 }
 0x244   :  { %312 = shalt.err (!%p309_p6)
}
 0x245   :  { %s313_s4 = scalar_lea.hbm %s431_s5, 256 }
 0x246   :  { %p314_p7 = scmp.ne.s32.totalorder %s431_s5, %s313_s4  ;;  %p317_p8 = scmp.lt.u32.totalorder %s313_s4, %s431_s5 }
 0x248   :  { %p319_p9 = pnand %p317_p8, %p314_p7 }
 0x24a   :  { %322 = shalt.err (!%p319_p9)
}
 0x24b   :  { %211 = dma.vmem_to_hbm [thread:$0]  %s206_s22, 256, %s431_s5, [#allocation5], %s330_s28, %s330_s28, %s331_s29  }
 0x24c   :  { %327 = dma.done.wait [#allocation5], 256  }
 0x24d   :  { %328 = vsyncadd [#allocation5], 4294967040 }
 0x24e   :  { %215 = vsyncpa [#allocation4], 1 }
 0x24f   :  { %216 = vsyncpa [#allocation7], 1 }
 0x250   :  { %217 = vsyncpa [#allocation5], 1 }

</bundles_post_ra>
